<compile_context>
chip_gen: v5e
topology: v5e:2x2
jax: 0.10.0
libtpu: 0.0.40
codegen_flags: <defaults>
</compile_context>

<pallas_src>
import functools

import jax
import jax.numpy as jnp
from jax.experimental import pallas as pl
from jax.experimental.pallas import tpu as pltpu

_VMEM_LIMIT_BYTES = 48 << 20  # > 16/32 MiB default scoped limits, < v7x 64 MiB physical


def _row_tile(n_rows: int, row_bytes: int, target_bytes: int = 4 << 20,
              min_steps: int = 8, min_block_bytes: int = 1 << 20) -> int:
    """Rows per block: a multiple of 8 (or the full row count), ~target_bytes big,
    and — when the row count permits — small enough that the grid has >= min_steps
    steps (>= 3-4 per v7x TensorCore after megacore sharding) so BlockSpec
    double-buffering hides the DMAs. Blocks are kept >= ~1 MiB so the ~0.35 us
    per-step overhead stays in the noise."""
    # TODO(synk): for very large H*W (an 8-row block alone blowing the VMEM budget)
    # tile the lane axis with an online (running max/sum) softmax instead of
    # whole-row blocks.
    if n_rows <= 8:
        return n_rows
    row_bytes = max(1, row_bytes)
    tr_cap = max(8, (target_bytes // row_bytes) // 8 * 8)
    # Rows per block that still leaves >= min_steps grid steps.
    tr_steps = max(8, (-(-n_rows // min_steps) + 7) // 8 * 8)
    tr = min(tr_cap, tr_steps)
    if tr * row_bytes < min_block_bytes:
        tr = min(tr_cap, max(tr, (min_block_bytes // row_bytes + 7) // 8 * 8))
    return n_rows if tr >= n_rows else tr


def _sigmoid(v, approx):
    # Numerically stable: exp() only ever sees a non-positive argument (EUP op).
    z = jnp.exp(-jnp.abs(v))
    r = pl.reciprocal(1.0 + z, approx=approx)
    return jnp.where(v >= 0.0, r, z * r)


def _softmax_rows(v, approx):
    # Per-row softmax over the flattened spatial dim (softmax_2d semantics).
    m = jnp.max(v, axis=-1, keepdims=True)    # XLU lane reduction, keepdims (no 0-d)
    e = jnp.exp(v - m)
    s = jnp.sum(e, axis=-1, keepdims=True)
    return e * pl.reciprocal(s, approx=approx)


def _apply(v, mode, approx):
    return _sigmoid(v, approx) if mode == "sigmoid" else _softmax_rows(v, approx)


def _single_mode_kernel(x_ref, o_ref, *, mode: str, approx: bool):
    """Both channels share one mode. Block: (rows, H*W); row r = (sample r//2,
    channel r%2) with the spatial dims flattened along the lane axis."""
    x = x_ref[...].astype(jnp.float32)  # single upcast; HBM traffic stays in input dtype
    o_ref[...] = _apply(x, mode, approx).astype(o_ref.dtype)


def _lane_fold_kernel(x_ref, o_ref, *, hw: int, channel_0: str, channel_1: str,
                      approx: bool):
    """Mixed-mode fast path. Block: (samples, 2*H*W); channel 0 is the static lane
    slab [:, :hw], channel 1 is [:, hw:] (hw % 128 == 0, so both slabs are
    lane-tile aligned). Each element runs exactly one normalization."""
    x0 = x_ref[:, :hw].astype(jnp.float32)
    x1 = x_ref[:, hw:].astype(jnp.float32)
    o_ref[:, :hw] = _apply(x0, channel_0, approx).astype(o_ref.dtype)
    o_ref[:, hw:] = _apply(x1, channel_1, approx).astype(o_ref.dtype)


def _parity_kernel(x_ref, o_ref, *, channel_0: str, channel_1: str, approx: bool):
    """Mixed-mode fallback for H*W not a multiple of 128. Even rows = channel 0,
    odd rows = channel 1 (rows/block is a multiple of 8, so parity is
    block-invariant). Computes both normalizations and selects; only used when the
    lane-fold layout would cross a lane-tile boundary."""
    x = x_ref[...].astype(jnp.float32)
    row_ids = jax.lax.broadcasted_iota(jnp.int32, x.shape, 0)
    is_c0 = (row_ids & 1) == 0
    y = jnp.where(is_c0, _apply(x, channel_0, approx), _apply(x, channel_1, approx))
    o_ref[...] = y.astype(o_ref.dtype)


class BaseModelPallas:
    """JAX/Pallas analogue of BaseModel: only the concrete method
    (_normalize_decoder_output) carries compute; the GP-anticipation hooks are
    abstract in the reference and raise here as well."""

    def __init__(self, channel_0: str = "sigmoid", channel_1: str = "softmax",
                 donate_input: bool = False, approx_reciprocal: bool = True):
        assert channel_0 in ("sigmoid", "softmax")
        assert channel_1 in ("sigmoid", "softmax")
        self.channel_0 = channel_0
        self.channel_1 = channel_1
        # Optional in-place normalization (HBM-capacity win; bytes moved unchanged).
        # Note: a true in-place update also needs jax.jit(donate_argnums=...) upstream.
        self.donate_input = donate_input
        self.approx_reciprocal = approx_reciprocal

    def forward(self, x):
        gp_outputs = self._do_gp_anticipation(x)   # abstract in the reference
        return dict(gp_outputs)

    def _create_gp_models(self):
        raise NotImplementedError

    def _do_gp_anticipation(self, x):
        raise NotImplementedError

    def _normalize_decoder_output(self, x_dec):
        B, C, H, W = x_dec.shape
        assert C == 2, "decoder output must have exactly 2 channels"
        hw = H * W
        itemsize = jnp.dtype(x_dec.dtype).itemsize
        approx = self.approx_reciprocal

        same_mode = self.channel_0 == self.channel_1
        lane_fold = (not same_mode) and (hw % 128 == 0)

        if lane_fold:
            # (B, 2, H, W) -> (B, 2*H*W): free row-major reshape; channel 0 lands in
            # the first hw lanes of each row, channel 1 in the last hw lanes.
            n_rows, row_elems = B, 2 * hw
            kernel = functools.partial(_lane_fold_kernel, hw=hw,
                                       channel_0=self.channel_0,
                                       channel_1=self.channel_1, approx=approx)
        elif same_mode:
            n_rows, row_elems = B * C, hw
            kernel = functools.partial(_single_mode_kernel, mode=self.channel_0,
                                       approx=approx)
        else:
            n_rows, row_elems = B * C, hw
            kernel = functools.partial(_parity_kernel, channel_0=self.channel_0,
                                       channel_1=self.channel_1, approx=approx)

        x2 = x_dec.reshape(n_rows, row_elems)   # free (row-major) reshape, lane-dense
        tr = _row_tile(n_rows, row_elems * itemsize)
        grid = (pl.cdiv(n_rows, tr),)

        out2 = pl.pallas_call(
            kernel,
            out_shape=jax.ShapeDtypeStruct((n_rows, row_elems), x_dec.dtype),
            grid=grid,
            in_specs=[pl.BlockSpec((tr, row_elems), lambda g: (g, 0))],
            out_specs=pl.BlockSpec((tr, row_elems), lambda g: (g, 0)),
            input_output_aliases={0: 0} if self.donate_input else {},
            compiler_params=pltpu.CompilerParams(
                dimension_semantics=("parallel",),
                vmem_limit_bytes=_VMEM_LIMIT_BYTES),
        )(x2)
        return out2.reshape(B, C, H, W)


def _reference(x_dec, channel_0, channel_1):
    def norm(c, mode):
        if mode == "sigmoid":
            return jax.nn.sigmoid(c)
        b, h, w = c.shape
        return jax.nn.softmax(c.reshape(b, h * w), axis=-1).reshape(b, h, w)

    y0 = norm(x_dec[:, 0].astype(jnp.float32), channel_0)
    y1 = norm(x_dec[:, 1].astype(jnp.float32), channel_1)
    return jnp.stack([y0, y1], axis=1)


if __name__ == "__main__":
    key = jax.random.PRNGKey(0)
    B, C, H, W = 2, 2, 16, 16
    x_dec = jax.random.normal(key, (B, C, H, W), dtype=jnp.float32) * 4.0

    # Mixed config (default in the reference cfg): sigmoid on c0, softmax_2d on c1.
    # hw = 256 (multiple of 128) -> lane-fold fast path (one exp chain per element).
    model = BaseModelPallas(channel_0="sigmoid", channel_1="softmax")
    out = jax.block_until_ready(model._normalize_decoder_output(x_dec))
    ref = _reference(x_dec, "sigmoid", "softmax")
    assert out.shape == (B, C, H, W)
    assert bool(jnp.allclose(out, ref, atol=2e-3, rtol=2e-3)), "mismatch (sigmoid/softmax)"

    # Same-mode config exercises the single-function path.
    model_ss = BaseModelPallas(channel_0="sigmoid", channel_1="sigmoid")
    out_ss = jax.block_until_ready(model_ss._normalize_decoder_output(x_dec))
    ref_ss = _reference(x_dec, "sigmoid", "sigmoid")
    assert bool(jnp.allclose(out_ss, ref_ss, atol=2e-3, rtol=2e-3)), "mismatch (sigmoid/sigmoid)"

    # bf16 I/O path: HBM traffic stays bf16, math is f32 inside the kernel.
    x_bf16 = x_dec.astype(jnp.bfloat16)
    out_bf16 = jax.block_until_ready(model._normalize_decoder_output(x_bf16))
    ref_bf16 = _reference(x_bf16.astype(jnp.float32), "sigmoid", "softmax")
    assert out_bf16.dtype == jnp.bfloat16
    assert bool(jnp.allclose(out_bf16.astype(jnp.float32), ref_bf16,
                             atol=2e-2, rtol=2e-2)), "mismatch (bfloat16)"

    # Unaligned spatial size (H*W % 128 != 0) exercises the parity-select fallback.
    x_odd = jax.random.normal(jax.random.PRNGKey(1), (B, C, 10, 10),
                              dtype=jnp.float32) * 4.0
    out_odd = jax.block_until_ready(model._normalize_decoder_output(x_odd))
    ref_odd = _reference(x_odd, "sigmoid", "softmax")
    assert bool(jnp.allclose(out_odd, ref_odd, atol=2e-3, rtol=2e-3)), "mismatch (fallback)"

    print("KERNEL_OK")
</pallas_src>

<mosaic_0001>
module attributes {stable_mosaic.version = 11 : i64} {
  func.func @_lane_fold_kernel(%arg0: i32, %arg1: memref<2x512xf32, #tpu.memory_space<vmem>>, %arg2: memref<2x512xf32, #tpu.memory_space<vmem>>) attributes {dimension_semantics = [#tpu.dimension_semantics<parallel>], iteration_bounds = array<i64: 1>, scalar_prefetch = 0 : i64, scratch_operands = 0 : i64, tpu.core_type = #tpu.core_type<tc>, window_params = [{transform_indices = @transform_0, window_bounds = array<i64: 2, 512>}, {transform_indices = @transform_1, window_bounds = array<i64: 2, 512>}]} {
    %c0 = arith.constant 0 : index
    %c0_0 = arith.constant 0 : index
    %0 = vector.load %arg1[%c0, %c0_0] : memref<2x512xf32, #tpu.memory_space<vmem>>, vector<2x256xf32>
    %c0_1 = arith.constant 0 : index
    %c256 = arith.constant 256 : index
    %1 = vector.load %arg1[%c0_1, %c256] : memref<2x512xf32, #tpu.memory_space<vmem>>, vector<2x256xf32>
    %2 = math.absf %0 : vector<2x256xf32>
    %cst = arith.constant 0.000000e+00 : f32
    %3 = vector.broadcast %cst : f32 to vector<2x256xf32>
    %4 = arith.subf %3, %2 : vector<2x256xf32>
    %5 = math.exp %4 : vector<2x256xf32>
    %cst_2 = arith.constant 1.000000e+00 : f32
    %6 = vector.broadcast %cst_2 : f32 to vector<2x256xf32>
    %7 = arith.addf %6, %5 : vector<2x256xf32>
    %8 = tpu.reciprocal %7 {approx = true} : vector<2x256xf32> -> vector<2x256xf32>
    %cst_3 = arith.constant 0.000000e+00 : f32
    %9 = vector.broadcast %cst_3 : f32 to vector<2x256xf32>
    %10 = arith.cmpf oge, %0, %9 : vector<2x256xf32>
    %11 = arith.mulf %5, %8 : vector<2x256xf32>
    %12 = arith.select %10, %8, %11 : vector<2x256xi1>, vector<2x256xf32>
    %c0_4 = arith.constant 0 : index
    %c0_5 = arith.constant 0 : index
    %13 = vector.load %arg2[%c0_4, %c0_5] : memref<2x512xf32, #tpu.memory_space<vmem>>, vector<2x256xf32>
    tpu.vector_store %arg2[%c0_4, %c0_5], %12 {strides = array<i32>} : memref<2x512xf32, #tpu.memory_space<vmem>>, vector<2x256xf32>,
    %cst_6 = arith.constant dense<0xFF800000> : vector<2xf32>
    %14 = vector.multi_reduction <maximumf>, %1, %cst_6 [1] : vector<2x256xf32> to vector<2xf32>
    %15 = vector.shape_cast %14 : vector<2xf32> to vector<2x1xf32>
    %16 = vector.broadcast %15 : vector<2x1xf32> to vector<2x256xf32>
    %17 = arith.subf %1, %16 : vector<2x256xf32>
    %18 = math.exp %17 : vector<2x256xf32>
    %cst_7 = arith.constant dense<0.000000e+00> : vector<2xf32>
    %19 = vector.multi_reduction <add>, %18, %cst_7 [1] : vector<2x256xf32> to vector<2xf32>
    %20 = vector.shape_cast %19 : vector<2xf32> to vector<2x1xf32>
    %21 = tpu.reciprocal %20 {approx = true} : vector<2x1xf32> -> vector<2x1xf32>
    %22 = vector.broadcast %21 : vector<2x1xf32> to vector<2x256xf32>
    %23 = arith.mulf %18, %22 : vector<2x256xf32>
    %c0_8 = arith.constant 0 : index
    %c256_9 = arith.constant 256 : index
    %24 = vector.load %arg2[%c0_8, %c256_9] : memref<2x512xf32, #tpu.memory_space<vmem>>, vector<2x256xf32>
    tpu.vector_store %arg2[%c0_8, %c256_9], %23 {strides = array<i32>} : memref<2x512xf32, #tpu.memory_space<vmem>>, vector<2x256xf32>,
    return
  }
  func.func @transform_0(%arg0: i32) -> (i32, i32) {
    %c0_i32 = arith.constant 0 : i32
    %c0_i32_0 = arith.constant 0 : i32
    return %arg0, %c0_i32 : i32, i32
  }
  func.func @transform_1(%arg0: i32) -> (i32, i32) {
    %c0_i32 = arith.constant 0 : i32
    %c0_i32_0 = arith.constant 0 : i32
    return %arg0, %c0_i32 : i32, i32
  }
}

</mosaic_0001>

<bundles_post_ra>
// kernel: tpu_custom_call.1
= control target key start
LH: loop header
LB: loop body
LE: loop exit
PB: predicated region body
PF: predicated region fallthrough
CT: control target
= control target key end

     0   :  { %6 = vsyncpa [#allocation3], 0  ;;  %s179_s0 = inlined_call_operand.hbm [shape: f32[2,512], index: 0, kind: input, shape index: {}]   ;;  %s180_s1 = inlined_call_operand.hbm [shape: f32[2,512], index: 1, kind: output, shape index: {}]  }
   0x1   :  { %7 = vsyncpa [#allocation4], 0  ;;  %s13_s8 = sshll.u32 %s179_s0, 4  ;;  %s156_s9 = smov [#allocation2]   ;;  %s14_s8 = int_to_ptr.hbm [resolvable:$true] %s13_s8 }
   0x2   :  { %s15_s10 = sshll.u32 %s156_s9, 4  ;;  %s16_s10 = int_to_ptr.vmem [resolvable:$true] %s15_s10 }
   0x3   :  { %18 = dma.hbm_to_vmem [thread:$0]  %s14_s8, 128, %s16_s10, [#allocation3]  }
   0x4   :  { %152 = dma.done.wait [#allocation3], 128  }
   0x5   :  { %153 = vsyncadd [#allocation3], 4294967168  ;;  %v24_v0 = vld [vmem:[#allocation2 + $0x4] sm:$0xf]  ;;  %vm41_vm0 = vcmask 1041408   ;;  %s158_s0 = smov [#allocation5]  }
   0x6   :  { %36 = vst [vmem:[#allocation1] ss:$4 sm:$0xff] %v24_v0  ;;  %v157_v6 = vmov 269488144   ;;  %v23_v19 = vld [vmem:[#allocation2] sm:$0xf] }
   0x7   :  { %v49_v7 = vunpack.c.l.s4 %v157_v6  ;;  %v25_v20 = vand.u32 2147483647, %v23_v19  ;;  %vm31_vm1 = vcmp.ge.f32.partialorder %v23_v19, 0.0  ;;  %s81_s11 = sshll.u32 %s158_s0, 4  ;;  %s83_s14 = sshll.u32 %s180_s1, 4  ;;  %s82_s11 = int_to_ptr.vmem [resolvable:$true] %s81_s11  ;;  %s84_s14 = int_to_ptr.hbm [resolvable:$true] %s83_s14 }
   0x9   :  { %v50_v8 = vunpack.c.0.s8 %v49_v7  ;;  %v26_v21 = vsub.f32 0.0, %v25_v20 }
   0xb   :  { %v27_v22 = vmul.f32 1.442695, %v26_v21 }
   0xd   :  { %v37_v1 = vld.sshfl [vmem:[#allocation1] sm:$0xff pattern:$0x73625140]  ;;  %v38_v2 = vld.sshfl [vmem:[#allocation1 + $0x8] sm:$0xff pattern:$0x73625140] }
   0xe   :  { %v42_v3 = vsel %vm41_vm0, %v37_v1, -inf  ;;  %v43_v4 = vsel %vm41_vm0, %v38_v2, -inf }
   0xf   :  { %v44_v5 = vmax.f32 %v42_v3, %v43_v4 }
  0x11   :  { %45 = vmax.xlane.f32.xlu0 %v44_v5 }
  0x84   :  { %v46_v9 = vpop.xlane.xlu0 %45 }
  0x85   :  { %v51_v10 = vperm.slane %v46_v9, %v50_v8 }
  0x87   :  { %v53_v11 = vsub.f32 %v24_v0, %v51_v10 }
  0x89   :  { %v54_v12 = vmul.f32 1.442695, %v53_v11 }
  0x8b   :  { %96 = vpow2.f32 %v54_v12 }
  0x8c   :  { %98 = vpow2.f32 %v27_v22 }
  0x91   :  { %v97_v13 = vpop.eup %96 }
  0x92   :  { %57 = vst [vmem:[#allocation1] ss:$4 sm:$0xff] %v97_v13  ;;  %v99_v23 = vpop.eup %98 }
  0x93   :  { %v29_v24 = vadd.f32 1.0, %v99_v23 }
  0x95   :  { %100 = vrcp.f32 %v29_v24 }
  0x99   :  { %v58_v14 = vld.sshfl [vmem:[#allocation1] sm:$0xff pattern:$0x73625140]  ;;  %v59_v15 = vld.sshfl [vmem:[#allocation1 + $0x8] sm:$0xff pattern:$0x73625140] }
  0x9a   :  { %v62_v16 = vsel %vm41_vm0, %v58_v14, 0.0  ;;  %v63_v17 = vsel %vm41_vm0, %v59_v15, 0.0 }
  0x9b   :  { %v64_v18 = vadd.f32 %v63_v17, %v62_v16  ;;  %v101_v25 = vpop.eup %100 }
  0x9c   :  { %v32_v26 = vmul.f32 %v101_v25, %v99_v23 }
  0x9d   :  { %65 = vadd.xlane.f32.xlu0 %v64_v18 }
  0x9e   :  { %v33_v27 = vsel %vm31_vm1, %v101_v25, %v32_v26 }
  0x9f   :  { %34 = vst [vmem:[#allocation5] sm:$0xf] %v33_v27 }
 0x110   :  { %v66_v28 = vpop.xlane.xlu0 %65 }
 0x111   :  { %102 = vrcp.f32 %v66_v28 }
 0x117   :  { %v103_v29 = vpop.eup %102 }
 0x118   :  { %v72_v30 = vperm.slane %v103_v29, %v50_v8 }
 0x11a   :  { %v74_v31 = vmul.f32 %v97_v13, %v72_v30 }
 0x11c   :  { %75 = vst [vmem:[#allocation5 + $0x4] sm:$0xf] %v74_v31 }
 0x11d   :  { %86 = dma.vmem_to_hbm [thread:$0]  %s82_s11, 128, %s84_s14, [#allocation4]  }
 0x11e   :  { %154 = dma.done.wait [#allocation4], 128  }
 0x11f   :  { %155 = vsyncadd [#allocation4], 4294967168 }
 0x120   :  { %91 = vsyncpa [#allocation3], 1 }
 0x121   :  { %92 = vsyncpa [#allocation4], 1 }

</bundles_post_ra>
